<compile_context>
chip_gen: v7x
topology: tpu7x:2x2x1
jax: 0.10.0
libtpu: 0.0.40
codegen_flags: <defaults>
</compile_context>

<pallas_src>
import jax
import jax.numpy as jnp
from jax.experimental import pallas as pl
from jax.experimental.pallas import tpu as pltpu


LANE = 128


def _round_up(x, m):
    return (x + m - 1) // m * m


def _pad_to(x, shape):
    return jnp.pad(x, [(0, s - d) for d, s in zip(x.shape, shape)])


# ------------------------------ fused kernel ------------------------------- #

def _medclip_kernel(scale_ref,     # SMEM (1,1) f32 : exp(logit_scale), precomputed
                    patches_ref,   # VMEM [B*Np, Cpp_p]  bf16
                    wp_ref,        # VMEM [Cpp_p, Dh_p]  bf16
                    bp_ref,        # VMEM [1, Dh_p]      f32
                    pool_ref,      # VMEM [B, B*Np]      bf16 (1/Np pooling matrix)
                    wproj_ref,     # VMEM [Dh_p, De_p]   bf16
                    bproj_ref,     # VMEM [1, De_p]      f32
                    txt_ref,       # VMEM [T_p, De_p]    bf16
                    out_ref):      # VMEM [B, T_p]       f32
    # Patch embedding: single lane-dense 2-D matmul (bf16 MXU, f32 accumulate).
    h = jnp.dot(patches_ref[...], wp_ref[...],
                preferred_element_type=jnp.float32)            # [B*Np, Dh_p] f32
    h = jnp.maximum(h + bp_ref[...], 0.0)                      # bias + ReLU (f32 VPU)

    # Global average pool over patches, expressed as a tiny MXU matmul with a
    # precomputed (1/Np) block-diagonal pooling matrix.  Avoids 3-D reshapes
    # and middle-axis reductions inside the kernel.
    pooled = jnp.dot(pool_ref[...], h.astype(jnp.bfloat16),
                     preferred_element_type=jnp.float32)       # [B, Dh_p] f32

    # Projection head (bf16 MXU, f32 accumulate + f32 bias).
    feats = jnp.dot(pooled.astype(jnp.bfloat16), wproj_ref[...],
                    preferred_element_type=jnp.float32) + bproj_ref[...]  # [B, De_p]

    # Image-only L2 norm (padded columns are exactly zero => sum of squares is
    # exact); rsqrt on the EUP; exp(logit_scale) folded into the image features.
    ss = jnp.sum(feats * feats, axis=-1, keepdims=True)
    img_n = feats * jax.lax.rsqrt(ss) * scale_ref[0, 0]        # [B, De_p] f32

    # logits = scale * img_n @ text.T  (bf16 MXU, f32 accumulate, lane-dense store).
    out_ref[...] = jax.lax.dot_general(
        img_n.astype(jnp.bfloat16), txt_ref[...],
        dimension_numbers=(((1,), (1,)), ((), ())),
        preferred_element_type=jnp.float32)                    # [B, T_p] f32


# -------------------------------- wrapper ----------------------------------- #

def custom_medclip_forward(image, text_features, params):
    """image: [B, C, H, W] (NCHW).  text_features: [T, De].  Returns [B, T] f32."""
    B, C, H, W = image.shape
    P = params["patch_size"]
    Hp, Wp = H // P, W // P
    Np = Hp * Wp
    Cpp = C * P * P
    Dh = params["wp"].shape[1]
    De = params["wproj"].shape[1]
    T = text_features.shape[0]

    Cpp_p = _round_up(Cpp, LANE)
    Dh_p = _round_up(Dh, LANE)
    De_p = _round_up(De, LANE)
    T_p = _round_up(T, LANE)

    x = image.astype(jnp.float32)                              # image.type(self.dtype)
    # NHWC-first patchify: contiguous last dim, then pad to lane granularity.
    patches = (
        x.transpose(0, 2, 3, 1)                                # [B, H, W, C]
         .reshape(B, Hp, P, Wp, P, C)
         .transpose(0, 1, 3, 2, 4, 5)                          # [B, Hp, Wp, P, P, C]
         .reshape(B * Np, Cpp)
    )
    patches_p = _pad_to(patches, (B * Np, Cpp_p)).astype(jnp.bfloat16)

    wp_p = _pad_to(params["wp"].astype(jnp.float32), (Cpp_p, Dh_p)).astype(jnp.bfloat16)
    bp_p = _pad_to(params["bp"].astype(jnp.float32), (1, Dh_p))
    wproj_p = _pad_to(params["wproj"].astype(jnp.float32), (Dh_p, De_p)).astype(jnp.bfloat16)
    bproj_p = _pad_to(params["bproj"].astype(jnp.float32), (1, De_p))
    txt_p = _pad_to(text_features.astype(jnp.float32), (T_p, De_p)).astype(jnp.bfloat16)

    # Mean-pool matrix: row b has 1/Np on columns [b*Np, (b+1)*Np). 1/Np here is
    # a power of two (Np=16) so the bf16 cast is exact.
    pool = (jnp.repeat(jnp.eye(B, dtype=jnp.float32), Np, axis=1) / Np).astype(jnp.bfloat16)

    # exp(logit_scale) computed once host-side; (1,1) scalar lands in SMEM.
    scale = jnp.exp(params["logit_scale"].astype(jnp.float32)).reshape(1, 1)

    flops = (2 * B * Np * Cpp_p * Dh_p
             + 2 * B * (B * Np) * Dh_p
             + 2 * B * Dh_p * De_p
             + 2 * B * De_p * T_p)
    bytes_accessed = (patches_p.size * 2 + wp_p.size * 2 + wproj_p.size * 2
                      + txt_p.size * 2 + pool.size * 2
                      + bp_p.size * 4 + bproj_p.size * 4 + B * T_p * 4 + 4)

    logits_p = pl.pallas_call(
        _medclip_kernel,
        out_shape=jax.ShapeDtypeStruct((B, T_p), jnp.float32),
        in_specs=[
            pl.BlockSpec(memory_space=pltpu.MemorySpace.SMEM),   # exp(logit_scale)
            pl.BlockSpec(memory_space=pltpu.MemorySpace.VMEM),   # patches
            pl.BlockSpec(memory_space=pltpu.MemorySpace.VMEM),   # wp
            pl.BlockSpec(memory_space=pltpu.MemorySpace.VMEM),   # bp
            pl.BlockSpec(memory_space=pltpu.MemorySpace.VMEM),   # pool matrix
            pl.BlockSpec(memory_space=pltpu.MemorySpace.VMEM),   # wproj
            pl.BlockSpec(memory_space=pltpu.MemorySpace.VMEM),   # bproj
            pl.BlockSpec(memory_space=pltpu.MemorySpace.VMEM),   # text features
        ],
        out_specs=pl.BlockSpec(memory_space=pltpu.MemorySpace.VMEM),
        compiler_params=pltpu.CompilerParams(vmem_limit_bytes=64 * 1024 * 1024),
        cost_estimate=pl.CostEstimate(
            flops=flops, transcendentals=B, bytes_accessed=bytes_accessed),
    )(scale, patches_p, wp_p, bp_p, pool, wproj_p, bproj_p, txt_p)

    # TODO(synk): for real MedCLIP sizes (B=256, 224x224) add a B-tiled grid with
    # dimension_semantics=("parallel",) to shard across v7x's two TensorCores.
    return logits_p[:, :T]


# ------------------------ plain-JAX reference (f32) ------------------------- #

def _reference(image, text_features, params):
    B, C, H, W = image.shape
    P = params["patch_size"]
    Hp, Wp = H // P, W // P
    x = image.astype(jnp.float32)
    patches = (
        x.transpose(0, 2, 3, 1)
         .reshape(B, Hp, P, Wp, P, C)
         .transpose(0, 1, 3, 2, 4, 5)
         .reshape(B, Hp * Wp, C * P * P)
    )
    h = jnp.maximum(jnp.einsum("bpc,cd->bpd", patches, params["wp"])
                    + params["bp"][None, :, :], 0.0)
    pooled = jnp.mean(h, axis=1)
    feats = pooled @ params["wproj"] + params["bproj"]
    feats = feats / jnp.linalg.norm(feats, axis=-1, keepdims=True)
    scale = jnp.exp(params["logit_scale"][0, 0])
    return scale * feats @ text_features.T


# ---------------------------------- main ------------------------------------ #

if __name__ == "__main__":
    B, C, H, W = 2, 3, 16, 16      # small NCHW image
    P = 4                          # patch size -> 16 patches of dim 48
    Dh, De, T = 32, 64, 8          # hidden, embed, num text prompts

    key = jax.random.PRNGKey(0)
    k_img, k_txt, k_wp, k_wproj = jax.random.split(key, 4)

    image = jax.random.normal(k_img, (B, C, H, W), jnp.float32)
    text_features = jax.random.normal(k_txt, (T, De), jnp.float32)

    Cpp = C * P * P
    params = {
        "patch_size": P,
        "wp": 0.02 * jax.random.normal(k_wp, (Cpp, Dh), jnp.float32),
        "bp": jnp.zeros((1, Dh), jnp.float32),
        "wproj": 0.02 * jax.random.normal(k_wproj, (Dh, De), jnp.float32),
        "bproj": jnp.zeros((1, De), jnp.float32),
        # MedCLIP-style init: logit_scale = log(1/0.07)
        "logit_scale": jnp.full((1, 1), jnp.log(1.0 / 0.07), jnp.float32),
    }

    logits = custom_medclip_forward(image, text_features, params)
    jax.block_until_ready(logits)
    assert logits.shape == (B, T) and logits.dtype == jnp.float32

    ref = _reference(image, text_features, params)
    max_err = float(jnp.max(jnp.abs(logits - ref)))
    max_ref = float(jnp.max(jnp.abs(ref)))
    assert jnp.all(jnp.isfinite(logits)), "non-finite logits"
    assert max_err <= 0.05 * max_ref + 1e-3, f"mismatch: {max_err} vs ref max {max_ref}"

    print("KERNEL_OK")
</pallas_src>

<mosaic_0001>
module attributes {stable_mosaic.version = 11 : i64} {
  func.func @_medclip_kernel(%arg0: memref<1x1xf32, #tpu.memory_space<smem>>, %arg1: memref<32x128xbf16, #tpu.memory_space<vmem>>, %arg2: memref<128x128xbf16, #tpu.memory_space<vmem>>, %arg3: memref<1x128xf32, #tpu.memory_space<vmem>>, %arg4: memref<2x32xbf16, #tpu.memory_space<vmem>>, %arg5: memref<128x128xbf16, #tpu.memory_space<vmem>>, %arg6: memref<1x128xf32, #tpu.memory_space<vmem>>, %arg7: memref<128x128xbf16, #tpu.memory_space<vmem>>, %arg8: memref<2x128xf32, #tpu.memory_space<vmem>>) attributes {dimension_semantics = [], scalar_prefetch = 0 : i64, scratch_operands = 0 : i64, tpu.core_type = #tpu.core_type<tc>} {
    %c0 = arith.constant 0 : index
    %c0_0 = arith.constant 0 : index
    %0 = vector.load %arg1[%c0, %c0_0] : memref<32x128xbf16, #tpu.memory_space<vmem>>, vector<32x128xbf16>
    %c0_1 = arith.constant 0 : index
    %c0_2 = arith.constant 0 : index
    %1 = vector.load %arg2[%c0_1, %c0_2] : memref<128x128xbf16, #tpu.memory_space<vmem>>, vector<128x128xbf16>
    %cst = arith.constant dense<0.000000e+00> : vector<32x128xf32>
    %2 = tpu.matmul %0, %1, %cst {dimension_numbers = #tpu.dot_dimension_numbers<[1], [0], [0], [1], [0, 0, 1, 1], [], []>} : vector<32x128xbf16>, vector<128x128xbf16>, vector<32x128xf32> -> vector<32x128xf32>
    %c0_3 = arith.constant 0 : index
    %c0_4 = arith.constant 0 : index
    %3 = vector.load %arg3[%c0_3, %c0_4] : memref<1x128xf32, #tpu.memory_space<vmem>>, vector<1x128xf32>
    %4 = vector.broadcast %3 : vector<1x128xf32> to vector<32x128xf32>
    %5 = arith.addf %2, %4 : vector<32x128xf32>
    %cst_5 = arith.constant 0.000000e+00 : f32
    %6 = vector.broadcast %cst_5 : f32 to vector<32x128xf32>
    %7 = arith.maximumf %5, %6 : vector<32x128xf32>
    %c0_6 = arith.constant 0 : index
    %c0_7 = arith.constant 0 : index
    %8 = vector.load %arg4[%c0_6, %c0_7] : memref<2x32xbf16, #tpu.memory_space<vmem>>, vector<2x32xbf16>
    %9 = arith.truncf %7 : vector<32x128xf32> to vector<32x128xbf16>
    %cst_8 = arith.constant dense<0.000000e+00> : vector<2x128xf32>
    %10 = tpu.matmul %8, %9, %cst_8 {dimension_numbers = #tpu.dot_dimension_numbers<[1], [0], [0], [1], [0, 0, 1, 1], [], []>} : vector<2x32xbf16>, vector<32x128xbf16>, vector<2x128xf32> -> vector<2x128xf32>
    %11 = arith.truncf %10 : vector<2x128xf32> to vector<2x128xbf16>
    %c0_9 = arith.constant 0 : index
    %c0_10 = arith.constant 0 : index
    %12 = vector.load %arg5[%c0_9, %c0_10] : memref<128x128xbf16, #tpu.memory_space<vmem>>, vector<128x128xbf16>
    %cst_11 = arith.constant dense<0.000000e+00> : vector<2x128xf32>
    %13 = tpu.matmul %11, %12, %cst_11 {dimension_numbers = #tpu.dot_dimension_numbers<[1], [0], [0], [1], [0, 0, 1, 1], [], []>} : vector<2x128xbf16>, vector<128x128xbf16>, vector<2x128xf32> -> vector<2x128xf32>
    %c0_12 = arith.constant 0 : index
    %c0_13 = arith.constant 0 : index
    %14 = vector.load %arg6[%c0_12, %c0_13] : memref<1x128xf32, #tpu.memory_space<vmem>>, vector<1x128xf32>
    %15 = vector.broadcast %14 : vector<1x128xf32> to vector<2x128xf32>
    %16 = arith.addf %13, %15 : vector<2x128xf32>
    %17 = arith.mulf %16, %16 : vector<2x128xf32>
    %cst_14 = arith.constant dense<0.000000e+00> : vector<2xf32>
    %18 = vector.multi_reduction <add>, %17, %cst_14 [1] : vector<2x128xf32> to vector<2xf32>
    %19 = vector.shape_cast %18 : vector<2xf32> to vector<2x1xf32>
    %20 = math.rsqrt %19 : vector<2x1xf32>
    %21 = vector.broadcast %20 : vector<2x1xf32> to vector<2x128xf32>
    %22 = arith.mulf %16, %21 : vector<2x128xf32>
    %c0_15 = arith.constant 0 : index
    %c0_16 = arith.constant 0 : index
    %23 = memref.load %arg0[%c0_15, %c0_16] : memref<1x1xf32, #tpu.memory_space<smem>>
    %24 = vector.broadcast %23 : f32 to vector<2x128xf32>
    %25 = arith.mulf %22, %24 : vector<2x128xf32>
    %26 = arith.truncf %25 : vector<2x128xf32> to vector<2x128xbf16>
    %c0_17 = arith.constant 0 : index
    %c0_18 = arith.constant 0 : index
    %27 = vector.load %arg7[%c0_17, %c0_18] : memref<128x128xbf16, #tpu.memory_space<vmem>>, vector<128x128xbf16>
    %cst_19 = arith.constant dense<0.000000e+00> : vector<2x128xf32>
    %28 = tpu.matmul %26, %27, %cst_19 {dimension_numbers = #tpu.dot_dimension_numbers<[1], [1], [0], [0], [0, 0, 1, 0], [], []>} : vector<2x128xbf16>, vector<128x128xbf16>, vector<2x128xf32> -> vector<2x128xf32>
    %c0_20 = arith.constant 0 : index
    %c0_21 = arith.constant 0 : index
    %29 = vector.load %arg8[%c0_20, %c0_21] : memref<2x128xf32, #tpu.memory_space<vmem>>, vector<2x128xf32>
    tpu.vector_store %arg8[%c0_20, %c0_21], %28 {strides = array<i32>} : memref<2x128xf32, #tpu.memory_space<vmem>>, vector<2x128xf32>,
    return
  }
}

</mosaic_0001>

<bundles_post_ra>
// kernel: tpu_custom_call.1
= control target key start
LH: loop header
LB: loop body
LE: loop exit
PB: predicated region body
PF: predicated region fallthrough
CT: control target
= control target key end

     0   :  { %14 = vsyncpa [#allocation4], 0  ;;  %s1122_s0 = inlined_call_operand.<no memory space> [shape: f32[1,1], index: 0, kind: input, shape index: {}]   ;;  %s1123_s1 = inlined_call_operand.hbm [shape: bf16[32,128], index: 1, kind: input, shape index: {}]   ;;  %s1124_s2 = inlined_call_operand.hbm [shape: bf16[128,128], index: 2, kind: input, shape index: {}]   ;;  %s1125_s3 = inlined_call_operand.hbm [shape: f32[1,128], index: 3, kind: input, shape index: {}]   ;;  %s1126_s4 = inlined_call_operand.hbm [shape: bf16[2,32], index: 4, kind: input, shape index: {}]   ;;  %s1127_s5 = inlined_call_operand.hbm [shape: bf16[128,128], index: 5, kind: input, shape index: {}]   ;;  %s1128_s6 = inlined_call_operand.hbm [shape: f32[1,128], index: 6, kind: input, shape index: {}]   ;;  %s1129_s7 = inlined_call_operand.hbm [shape: bf16[128,128], index: 7, kind: input, shape index: {}]   ;;  %s1130_s8 = inlined_call_operand.hbm [shape: f32[2,128], index: 8, kind: output, shape index: {}]  }
   0x1   :  { %15 = vsyncpa [#allocation7], 0 }
   0x2   :  { %16 = vsyncpa [#allocation10], 0 }
   0x3   :  { %17 = vsyncpa [#allocation13], 0 }
   0x4   :  { %18 = vsyncpa [#allocation5], 0  ;;  %s908_s27 = smov [#allocation6]   ;;  %s909_s29 = smov [#allocation9]  }
   0x5   :  { %s38_s28 = sshll.u32 %s908_s27, 4  ;;  %s61_s30 = sshll.u32 %s909_s29, 4  ;;  %s39_s28 = int_to_ptr.vmem [resolvable:$true] %s38_s28  ;;  %s965_s30 = int_to_ptr.vmem [resolvable:$true] %s61_s30 }
   0x6   :  { %s722_s11 = scalar_lea.hbm %s1124_s2, 1024 }
   0x7   :  { %p723_p0 = scmp.ne.s32.totalorder %s1124_s2, %s722_s11  ;;  %p726_p1 = scmp.lt.u32.totalorder %s722_s11, %s1124_s2 }
   0x9   :  { %p728_p2 = pnand %p726_p1, %p723_p0 }
   0xb   :  { %731 = shalt.err (!%p728_p2)
}
   0xc   :  { %s732_s16 = scalar_lea.vmem %s39_s28, 1024  ;;  %p737_p4 = scmp.lt.s32.totalorder %s39_s28, %s39_s28 }
   0xd   :  { %p733_p3 = scmp.ne.s32.totalorder %s39_s28, %s732_s16  ;;  %p738_p5 = scmp.lt.s32.totalorder %s732_s16, %s732_s16 }
   0xf   :  { %p739_p6 = por %p738_p5, %p737_p4 }
  0x11   :  { %p740_p7 = pnand %p739_p6, %p733_p3 }
  0x13   :  { %743 = shalt.err (!%p740_p7)
}
  0x14   :  { %s910_s17 = smov 64   ;;  %s911_s18 = smov 4  }
  0x15   :  { %44 = dma.hbm_to_vmem [thread:$0]  %s1124_s2, 1024, %s39_s28, [#allocation7], %s910_s17, %s910_s17, %s911_s18  }
  0x16   :  { %s744_s23 = scalar_lea.hbm %s1126_s4, 16 }
  0x17   :  { %p745_p8 = scmp.ne.s32.totalorder %s1126_s4, %s744_s23  ;;  %p748_p9 = scmp.lt.u32.totalorder %s744_s23, %s1126_s4 }
  0x19   :  { %p750_p10 = pnand %p748_p9, %p745_p8 }
  0x1b   :  { %753 = shalt.err (!%p750_p10)
}
  0x1c   :  { %s754_s29 = scalar_lea.vmem %s965_s30, 16  ;;  %s758_s2 = scalar_lea.vmem %s965_s30, 32 }
  0x1d   :  { %p755_p11 = scmp.ne.s32.totalorder %s965_s30, %s754_s29  ;;  %p759_p12 = scmp.lt.s32.totalorder %s965_s30, %s965_s30 }
  0x1e   :  { %p760_p13 = scmp.lt.s32.totalorder %s758_s2, %s754_s29 }
  0x20   :  { %p761_p0 = por %p760_p13, %p759_p12 }
  0x22   :  { %p762_p1 = pnand %p761_p0, %p755_p11 }
  0x24   :  { %765 = shalt.err (!%p762_p1)
}
  0x25   :  { %64 = dma.hbm_to_vmem [thread:$0]  %s1126_s4, 16, %s965_s30, [#allocation10]  }
  0x26   :  { %s912_s10 = smov [#allocation12]   ;;  %s913_s12 = smov [#allocation3]  }
  0x27   :  { %s83_s11 = sshll.u32 %s912_s10, 4  ;;  %s26_s13 = sshll.u32 %s913_s12, 4  ;;  %s84_s11 = int_to_ptr.vmem [resolvable:$true] %s83_s11  ;;  %s1000_s13 = int_to_ptr.vmem [resolvable:$true] %s26_s13 }
  0x28   :  { %s766_s16 = scalar_lea.hbm %s1128_s6, 16 }
  0x29   :  { %p767_p2 = scmp.ne.s32.totalorder %s1128_s6, %s766_s16  ;;  %p770_p3 = scmp.lt.u32.totalorder %s766_s16, %s1128_s6 }
  0x2b   :  { %p772_p4 = pnand %p770_p3, %p767_p2 }
  0x2d   :  { %775 = shalt.err (!%p772_p4)
}
  0x2e   :  { %s776_s4 = scalar_lea.vmem %s84_s11, 16  ;;  %s780_s30 = scalar_lea.vmem %s84_s11, 32 }
  0x2f   :  { %p777_p5 = scmp.ne.s32.totalorder %s84_s11, %s776_s4  ;;  %p781_p6 = scmp.lt.s32.totalorder %s84_s11, %s84_s11 }
  0x30   :  { %p782_p7 = scmp.lt.s32.totalorder %s780_s30, %s776_s4 }
  0x32   :  { %p783_p8 = por %p782_p7, %p781_p6 }
  0x34   :  { %p784_p9 = pnand %p783_p8, %p777_p5 }
  0x36   :  { %787 = shalt.err (!%p784_p9)
}
  0x37   :  { %86 = dma.hbm_to_vmem [thread:$0]  %s1128_s6, 16, %s84_s11, [#allocation13]  }
  0x38   :  { %s788_s27 = scalar_lea.hbm %s1123_s1, 256 }
  0x39   :  { %p789_p10 = scmp.ne.s32.totalorder %s1123_s1, %s788_s27  ;;  %p792_p11 = scmp.lt.u32.totalorder %s788_s27, %s1123_s1 }
  0x3b   :  { %p794_p12 = pnand %p792_p11, %p789_p10 }
  0x3d   :  { %797 = shalt.err (!%p794_p12)
}
  0x3e   :  { %s798_s10 = scalar_lea.vmem %s1000_s13, 256  ;;  %p803_p0 = scmp.lt.s32.totalorder %s1000_s13, %s1000_s13 }
  0x3f   :  { %p799_p13 = scmp.ne.s32.totalorder %s1000_s13, %s798_s10  ;;  %p804_p1 = scmp.lt.s32.totalorder %s798_s10, %s798_s10 }
  0x41   :  { %p805_p2 = por %p804_p1, %p803_p0 }
  0x43   :  { %p806_p3 = pnand %p805_p2, %p799_p13 }
  0x45   :  { %809 = shalt.err (!%p806_p3)
}
  0x46   :  { %32 = dma.hbm_to_vmem [thread:$0]  %s1123_s1, 256, %s1000_s13, [#allocation4], %s910_s17, %s910_s17, %s911_s18  }
  0x47   :  { %s914_s12 = smov [#allocation8]   ;;  %s915_s15 = smov [#allocation11]  }
  0x48   :  { %s51_s14 = sshll.u32 %s914_s12, 4  ;;  %s70_s16 = sshll.u32 %s915_s15, 4  ;;  %s52_s14 = int_to_ptr.vmem [resolvable:$true] %s51_s14  ;;  %s1034_s16 = int_to_ptr.vmem [resolvable:$true] %s70_s16 }
  0x49   :  { %s810_s21 = scalar_lea.hbm %s1125_s3, 16 }
  0x4a   :  { %p811_p4 = scmp.ne.s32.totalorder %s1125_s3, %s810_s21  ;;  %p814_p5 = scmp.lt.u32.totalorder %s810_s21, %s1125_s3 }
  0x4c   :  { %p816_p6 = pnand %p814_p5, %p811_p4 }
  0x4e   :  { %819 = shalt.err (!%p816_p6)
}
  0x4f   :  { %s820_s1 = scalar_lea.vmem %s52_s14, 16  ;;  %s824_s13 = scalar_lea.vmem %s52_s14, 32 }
  0x50   :  { %p821_p7 = scmp.ne.s32.totalorder %s52_s14, %s820_s1  ;;  %p825_p8 = scmp.lt.s32.totalorder %s52_s14, %s52_s14 }
  0x51   :  { %p826_p9 = scmp.lt.s32.totalorder %s824_s13, %s820_s1 }
  0x53   :  { %p827_p10 = por %p826_p9, %p825_p8 }
  0x55   :  { %p828_p11 = pnand %p827_p10, %p821_p7 }
  0x57   :  { %831 = shalt.err (!%p828_p11)
}
  0x58   :  { %54 = dma.hbm_to_vmem [thread:$0]  %s1125_s3, 16, %s52_s14, [#allocation7]  }
  0x59   :  { %s832_s29 = scalar_lea.hbm %s1127_s5, 1024 }
  0x5a   :  { %p833_p12 = scmp.ne.s32.totalorder %s1127_s5, %s832_s29  ;;  %p836_p13 = scmp.lt.u32.totalorder %s832_s29, %s1127_s5 }
  0x5c   :  { %p838_p0 = pnand %p836_p13, %p833_p12 }
  0x5e   :  { %841 = shalt.err (!%p838_p0)
}
  0x5f   :  { %s842_s6 = scalar_lea.vmem %s1034_s16, 1024  ;;  %p847_p2 = scmp.lt.s32.totalorder %s1034_s16, %s1034_s16 }
  0x60   :  { %p843_p1 = scmp.ne.s32.totalorder %s1034_s16, %s842_s6  ;;  %p848_p3 = scmp.lt.s32.totalorder %s842_s6, %s842_s6 }
  0x62   :  { %p849_p4 = por %p848_p3, %p847_p2 }
  0x64   :  { %p850_p5 = pnand %p849_p4, %p843_p1 }
  0x66   :  { %853 = shalt.err (!%p850_p5)
}
  0x67   :  { %76 = dma.hbm_to_vmem [thread:$0]  %s1127_s5, 1024, %s1034_s16, [#allocation10], %s910_s17, %s910_s17, %s911_s18  }
  0x68   :  { %s916_s12 = smov [#allocation14]   ;;  %s854_s20 = scalar_lea.hbm %s1129_s7, 1024 }
  0x69   :  { %s92_s14 = sshll.u32 %s916_s12, 4  ;;  %p855_p6 = scmp.ne.s32.totalorder %s1129_s7, %s854_s20  ;;  %s93_s14 = int_to_ptr.vmem [resolvable:$true] %s92_s14 }
  0x6a   :  { %p858_p7 = scmp.lt.u32.totalorder %s854_s20, %s1129_s7 }
  0x6c   :  { %p860_p8 = pnand %p858_p7, %p855_p6 }
  0x6e   :  { %863 = shalt.err (!%p860_p8)
}
  0x6f   :  { %s864_s23 = scalar_lea.vmem %s93_s14, 1024  ;;  %p869_p10 = scmp.lt.s32.totalorder %s93_s14, %s93_s14 }
  0x70   :  { %p865_p9 = scmp.ne.s32.totalorder %s93_s14, %s864_s23  ;;  %p870_p11 = scmp.lt.s32.totalorder %s864_s23, %s864_s23 }
  0x72   :  { %p871_p12 = por %p870_p11, %p869_p10 }
  0x74   :  { %p872_p13 = pnand %p871_p12, %p865_p9 }
  0x76   :  { %875 = shalt.err (!%p872_p13)
}
  0x77   :  { %98 = dma.hbm_to_vmem [thread:$0]  %s1129_s7, 1024, %s93_s14, [#allocation13], %s910_s17, %s910_s17, %s911_s18  }
  0x78   :  { %898 = dma.done.wait [#allocation4], 256  }
  0x79   :  { %899 = vsyncadd [#allocation4], 4294967040 }
  0x7a   :  { %900 = dma.done.wait [#allocation7], 1040  }
  0x7b   :  { %901 = vsyncadd [#allocation7], 4294966256 }
  0x7c   :  { %902 = dma.done.wait [#allocation10], 1040  }
  0x7d   :  { %903 = vsyncadd [#allocation10], 4294966256 }
  0x7e   :  { %904 = dma.done.wait [#allocation13], 1040  }
  0x7f   :  { %905 = vsyncadd [#allocation13], 4294966256  ;;  %v694_v0 = vld [vmem:[#allocation6] sm:$0xff]   ;;  %v695_v1 = vld [vmem:[#allocation6 + $0x8] sm:$0xff]   ;;  %v917_v10 = vmov 0.0   ;;  %vm918_vm0 = vmmov 0   ;;  %v428_v58 = vstv %s1122_s0 }
  0x80   :  { %614 = vmatprep.subr.bf16.mxu1 %v694_v0  ;;  %v696_v2 = vld [vmem:[#allocation6 + $0x10] sm:$0xff]   ;;  %v697_v3 = vld [vmem:[#allocation6 + $0x18] sm:$0xff]   ;;  %v698_v5 = vld [vmem:[#allocation6 + $0x20] sm:$0xff]   ;;  %662 = vmatprep.subr.bf16.mxu0 %v917_v10  ;;  %vm264_vm1 = vcmask 261120   ;;  %vm421_vm2 = vcmask 1041408   ;;  %s919_s18 = smov [#allocation15]  }
  0x81   :  { %615 = vmatpush3.bf16.msra.mxu1 %v694_v0  ;;  %v702_v4 = vld [vmem:[#allocation3] sm:$0xff]   ;;  %v699_v6 = vld [vmem:[#allocation6 + $0x28] sm:$0xff]   ;;  %v701_v8 = vld [vmem:[#allocation6 + $0x38] sm:$0xff]   ;;  %678 = vmatprep.mubr.msk.bf16.mxu0 %vm918_vm0, %v917_v10  ;;  %s542_s1 = sshll.u32 %s919_s18, 4  ;;  %s543_s1 = int_to_ptr.vmem [resolvable:$true] %s542_s1 }
  0x82   :  { %616 = vmatprep.subr.bf16.mxu1 %v695_v1  ;;  %630 = vmatprep.mubr.bf16.mxu1 %v702_v4  ;;  %v700_v7 = vld [vmem:[#allocation6 + $0x30] sm:$0xff]   ;;  %v703_v9 = vld [vmem:[#allocation3 + $0x8] sm:$0xff]   ;;  %v554_v11 = vld [vmem:[#allocation8] ss:$0 sm:$0xff]  ;;  %s876_s13 = scalar_lea.vmem %s543_s1, 32  ;;  %p881_p1 = scmp.lt.s32.totalorder %s543_s1, %s543_s1 }
  0x83   :  { %v261_v26 = vld [vmem:[#allocation9] sm:$0x1]  ;;  %v704_v27 = vld [vmem:[#allocation11] sm:$0xff]   ;;  %v705_v28 = vld [vmem:[#allocation11 + $0x8] sm:$0xff]   ;;  %p877_p0 = scmp.ne.s32.totalorder %s543_s1, %s876_s13  ;;  %p882_p2 = scmp.lt.s32.totalorder %s876_s13, %s876_s13 }
  0x84   :  { %v706_v29 = vld [vmem:[#allocation11 + $0x10] sm:$0xff]   ;;  %v707_v30 = vld [vmem:[#allocation11 + $0x18] sm:$0xff]   ;;  %v708_v31 = vld [vmem:[#allocation11 + $0x20] sm:$0xff]  }
  0x85   :  { %617 = vmatpush3.bf16.msra.mxu1 %v695_v1  ;;  %v709_v32 = vld [vmem:[#allocation11 + $0x28] sm:$0xff]   ;;  %v710_v33 = vld [vmem:[#allocation11 + $0x30] sm:$0xff]   ;;  %v711_v34 = vld [vmem:[#allocation11 + $0x38] sm:$0xff]   ;;  %p883_p3 = por %p882_p2, %p881_p1 }
  0x86   :  { %618 = vmatprep.subr.bf16.mxu1 %v696_v2  ;;  %v712_v40 = vld [vmem:[#allocation14] sm:$0xff]   ;;  %v713_v41 = vld [vmem:[#allocation14 + $0x8] sm:$0xff]   ;;  %v714_v42 = vld [vmem:[#allocation14 + $0x10] sm:$0xff]  }
  0x87   :  { %663 = vmatpush3.bf16.xpose.msra.mxu0 %v712_v40  ;;  %v715_v43 = vld [vmem:[#allocation14 + $0x18] sm:$0xff]   ;;  %v716_v44 = vld [vmem:[#allocation14 + $0x20] sm:$0xff]   ;;  %v717_v45 = vld [vmem:[#allocation14 + $0x28] sm:$0xff]   ;;  %p884_p4 = pnand %p883_p3, %p877_p0 }
  0x88   :  { %664 = vmatprep.subr.bf16.mxu0 %v917_v10  ;;  %v566_v46 = vld [vmem:[#allocation12] ss:$0 sm:$0xff]  ;;  %v718_v54 = vld [vmem:[#allocation14 + $0x30] sm:$0xff]  }
  0x89   :  { %619 = vmatpush3.bf16.msra.mxu1 %v696_v2  ;;  %v719_v55 = vld [vmem:[#allocation14 + $0x38] sm:$0xff]  }
  0x8a   :  { %620 = vmatprep.subr.bf16.mxu1 %v697_v3 }
  0x8d   :  { %621 = vmatpush3.bf16.msra.mxu1 %v697_v3 }
  0x8e   :  { %622 = vmatprep.subr.bf16.mxu1 %v698_v5 }
  0x8f   :  { %665 = vmatpush3.bf16.xpose.msra.mxu0 %v713_v41 }
  0x90   :  { %666 = vmatprep.subr.bf16.mxu0 %v917_v10 }
  0x91   :  { %623 = vmatpush3.bf16.msra.mxu1 %v698_v5 }
  0x92   :  { %624 = vmatprep.subr.bf16.mxu1 %v699_v6 }
  0x95   :  { %625 = vmatpush3.bf16.msra.mxu1 %v699_v6 }
  0x96   :  { %626 = vmatprep.subr.bf16.mxu1 %v700_v7 }
  0x97   :  { %667 = vmatpush3.bf16.xpose.msra.mxu0 %v714_v42 }
  0x98   :  { %668 = vmatprep.subr.bf16.mxu0 %v917_v10 }
  0x99   :  { %627 = vmatpush3.bf16.msra.mxu1 %v700_v7 }
  0x9a   :  { %628 = vmatprep.subr.bf16.mxu1 %v701_v8 }
  0x9d   :  { %629 = vmatpush3.bf16.msra.mxu1 %v701_v8 }
  0x9e   :  { %634 = vmatprep.subr.bf16.mxu1 %v917_v10 }
  0x9f   :  { %669 = vmatpush3.bf16.xpose.msra.mxu0 %v715_v43 }
  0xa0   :  { %631 = vmatmul.mubr.bf16.vlgmr.msra.gmra.mrb[0].mxu1 %v703_v9  ;;  %670 = vmatprep.subr.bf16.mxu0 %v917_v10 }
  0xa1   :  { %638 = vmatprep.mubr.msk.bf16.mxu1 %vm918_vm0, %v917_v10 }
  0xa7   :  { %671 = vmatpush3.bf16.xpose.msra.mxu0 %v716_v44 }
  0xa8   :  { %672 = vmatprep.subr.bf16.mxu0 %v917_v10 }
  0xaf   :  { %673 = vmatpush3.bf16.xpose.msra.mxu0 %v717_v45 }
  0xb0   :  { %674 = vmatprep.subr.bf16.mxu0 %v917_v10 }
  0xb7   :  { %675 = vmatpush3.bf16.xpose.msra.mxu0 %v718_v54 }
  0xb8   :  { %676 = vmatprep.subr.bf16.mxu0 %v917_v10 }
  0xbf   :  { %677 = vmatpush3.bf16.xpose.msra.mxu0 %v719_v55 }
 0x173   :  { %v632_v12 = vpop.f32.mrb[0].mxu1 }
 0x174   :  { %v251_v13 = vadd.f32 %v632_v12, %v554_v11  ;;  %v242_v14 = vpop.f32.mrb[1].mxu1 }
 0x175   :  { %v243_v15 = vadd.f32 %v554_v11, %v242_v14  ;;  %v633_v16 = vpop.f32.mrb[2].mxu1 }
 0x176   :  { %v254_v17 = vadd.f32 %v633_v16, %v554_v11  ;;  %v245_v18 = vpop.f32.mrb[3].mxu1  ;;  %v259_v20 = vmax.f32 %v251_v13, 0.0 }
 0x177   :  { %v246_v19 = vadd.f32 %v554_v11, %v245_v18  ;;  %v257_v22 = vmax.f32 %v243_v15, 0.0 }
 0x178   :  { %v260_v21 = vmax.f32 %v254_v17, 0.0 }
 0x179   :  { %v258_v23 = vmax.f32 %v246_v19, 0.0 }
 0x17a   :  { %v263_v24 = vpack.c.bf16 %v260_v21, %v259_v20 }
 0x17b   :  { %v262_v25 = vpack.c.bf16 %v258_v23, %v257_v22 }
 0x17d   :  { %635 = vmatpush3.bf16.msra.mxu1 %v262_v25 }
 0x17e   :  { %636 = vmatprep.subr.bf16.mxu1 %v917_v10 }
 0x181   :  { %637 = vmatpush3.bf16.msra.mxu1 %v263_v24 }
 0x182   :  { %642 = vmatprep.subr.bf16.mxu1 %v917_v10 }
 0x184   :  { %639 = vmatmul.mubr.msk.bf16.vlgmr.msra.gmra.mrb[4].mxu1 %vm264_vm1, %v261_v26 }
 0x185   :  { %643 = vmatpush3.bf16.msra.mxu1 %v704_v27  ;;  %658 = vmatprep.mubr.msk.bf16.mxu1 %vm918_vm0, %v917_v10 }
 0x186   :  { %644 = vmatprep.subr.bf16.mxu1 %v917_v10 }
 0x189   :  { %645 = vmatpush3.bf16.msra.mxu1 %v705_v28 }
 0x18a   :  { %646 = vmatprep.subr.bf16.mxu1 %v917_v10 }
 0x18d   :  { %647 = vmatpush3.bf16.msra.mxu1 %v706_v29 }
 0x18e   :  { %648 = vmatprep.subr.bf16.mxu1 %v917_v10 }
 0x191   :  { %649 = vmatpush3.bf16.msra.mxu1 %v707_v30 }
 0x192   :  { %650 = vmatprep.subr.bf16.mxu1 %v917_v10 }
 0x195   :  { %651 = vmatpush3.bf16.msra.mxu1 %v708_v31 }
 0x196   :  { %652 = vmatprep.subr.bf16.mxu1 %v917_v10 }
 0x199   :  { %653 = vmatpush3.bf16.msra.mxu1 %v709_v32 }
 0x19a   :  { %654 = vmatprep.subr.bf16.mxu1 %v917_v10 }
 0x19d   :  { %655 = vmatpush3.bf16.msra.mxu1 %v710_v33 }
 0x19e   :  { %656 = vmatprep.subr.bf16.mxu1 %v917_v10 }
 0x1a1   :  { %657 = vmatpush3.bf16.msra.mxu1 %v711_v34 }
 0x257   :  { %v302_v35 = vpop.f32.mrb[4].mxu1 }
 0x258   :  { %v308_v36 = vpack.c.bf16 %v302_v35, %v302_v35  ;;  %v640_v37 = vpop.f32.mrb[5].mxu1 }
 0x259   :  { %v305_v38 = vpop.f32.mrb[6].mxu1 }
 0x25a   :  { %v641_v39 = vpop.f32.mrb[7].mxu1  ;;  %659 = vmatmul.mubr.bf16.vlgmr.msra.gmra.mrb[8].mxu1 %v308_v36 }
 0x32d   :  { %v414_v47 = vpop.f32.mrb[8].mxu1 }
 0x32e   :  { %v415_v48 = vadd.f32 %v566_v46, %v414_v47  ;;  %v660_v49 = vpop.f32.mrb[9].mxu1 }
 0x32f   :  { %v417_v50 = vpop.f32.mrb[10].mxu1 }
 0x330   :  { %v661_v51 = vpop.f32.mrb[11].mxu1  ;;  %v420_v52 = vmul.f32 %v415_v48, %v415_v48 }
 0x332   :  { %v422_v53 = vsel %vm421_vm2, %v420_v52, 0.0 }
 0x333   :  { %423 = vadd.xlane.f32.xlu0 %v422_v53 }
 0x3c0   :  { %v424_v56 = vpop.xlane.xlu0 %423 }
 0x3c1   :  { %720 = vrsqrt.f32 %v424_v56 }
 0x3cb   :  { %v721_v57 = vpop.eup %720 }
 0x3cc   :  { %v426_v59 = vmul.f32 %v721_v57, %v415_v48 }
 0x3ce   :  { %v429_v60 = vmul.f32 %v428_v58, %v426_v59 }
 0x3d0   :  { %v430_v61 = vpack.c.bf16 %v429_v60, %v429_v60 }
 0x3d2   :  { %679 = vmatmul.mubr.bf16.vlgmr.msra.gmra.mrb[0].mxu0 %v430_v61 }
 0x4a5   :  { %v529_v62 = vpop.f32.mrb[0].mxu0 }
 0x4a6   :  { %535 = vst [vmem:[#allocation15] sm:$0x3] %v529_v62  ;;  %v680_v63 = vpop.f32.mrb[1].mxu0 }
 0x4a7   :  { %v532_v0 = vpop.f32.mrb[2].mxu0 }
 0x4a8   :  { %887 = shalt.err (!%p884_p4)
}
 0x4a9   :  { %s888_s25 = scalar_lea.hbm %s1130_s8, 32 }
 0x4aa   :  { %p889_p5 = scmp.ne.s32.totalorder %s1130_s8, %s888_s25  ;;  %p892_p6 = scmp.lt.u32.totalorder %s888_s25, %s1130_s8 }
 0x4ac   :  { %p894_p7 = pnand %p892_p6, %p889_p5 }
 0x4ae   :  { %897 = shalt.err (!%p894_p7)
}
 0x4af   :  { %545 = dma.vmem_to_hbm [thread:$0]  %s543_s1, 32, %s1130_s8, [#allocation5]   ;;  %v681_v1 = vpop.f32.mrb[3].mxu0 }
 0x4b0   :  { %906 = dma.done.wait [#allocation5], 32  }
 0x4b1   :  { %907 = vsyncadd [#allocation5], 4294967264 }
 0x4b2   :  { %549 = vsyncpa [#allocation4], 1 }
 0x4b3   :  { %550 = vsyncpa [#allocation7], 1 }
 0x4b4   :  { %551 = vsyncpa [#allocation10], 1 }
 0x4b5   :  { %552 = vsyncpa [#allocation13], 1 }
 0x4b6   :  { %553 = vsyncpa [#allocation5], 1 }

</bundles_post_ra>
